<compile_context>
chip_gen: v6e
topology: v6e:2x2x1
jax: 0.10.0
libtpu: 0.0.40
codegen_flags: <defaults>
</compile_context>

<pallas_src>
import math

import jax
import jax.numpy as jnp
from jax.experimental import pallas as pl
from jax.experimental.pallas import tpu as pltpu

NUM_NEURON = 20
RATIO = 4.0
HIDDEN = int(NUM_NEURON * RATIO)   # 80
SPARSITY = 0.5                     # parser_args.sparsity
USE_BIAS = True                    # parser_args.bias
IN_FEATURES = 784
OUT_CLASSES = 10

LANE = 128
SUBLANE = 8
H_PAD = LANE                       # 80  -> 128
OUT_PAD = LANE                     # 10  -> 128

TB_MAX = 1024                      # per-tile VMEM ~8 MiB (f32 x, double-buffered)
MIN_TILES = 2                      # >=2 tiles so v7x's two TensorCores both get work


def _round_up(n, m):
    return ((n + m - 1) // m) * m


def _cdiv(a, b):
    return -(-a // b)


# ----------------------------------------------------------------------------
# Parameter construction (deterministic, mirrors SupermaskLinear.__init__ +
# the 'ep' branch of GetSubnet used in forward()).
# ----------------------------------------------------------------------------
def _ep_mask(scores_abs, k):
    """GetSubnet 'ep': bottom (1-k) fraction -> 0, top k fraction -> 1."""
    flat = scores_abs.reshape(-1)
    n = flat.shape[0]
    j = int((1.0 - k) * n)
    idx = jnp.argsort(flat)
    out = jnp.zeros_like(flat)
    out = out.at[idx[j:]].set(1.0)
    return out.reshape(scores_abs.shape)


def make_supermask_linear_params(key, in_f, out_f, k=SPARSITY):
    k_w, k_b, k_s, k_bs = jax.random.split(key, 4)
    # signed-constant weight: sign(init) * gain/sqrt(fan_in), gain(relu)=sqrt(2)
    std = math.sqrt(2.0) / math.sqrt(in_f)
    w_raw = jax.random.uniform(k_w, (out_f, in_f), minval=-1.0, maxval=1.0)
    weight = jnp.where(w_raw >= 0.0, std, -std).astype(jnp.float32)
    # nn.Linear default bias init: U(-1/sqrt(fan_in), 1/sqrt(fan_in))
    bound = 1.0 / math.sqrt(in_f)
    bias = jax.random.uniform(k_b, (out_f,), minval=-bound, maxval=bound
                              ).astype(jnp.float32)
    scores = jax.random.uniform(k_s, (out_f, in_f), minval=-1.0, maxval=1.0)
    bias_scores = jax.random.uniform(k_bs, (out_f,), minval=-1.0, maxval=1.0)
    mask = _ep_mask(jnp.abs(scores), k)
    bias_mask = _ep_mask(jnp.abs(bias_scores), k)
    w_eff = weight * mask
    b_eff = bias * bias_mask if USE_BIAS else bias
    return w_eff.astype(jnp.float32), b_eff.astype(jnp.float32)


# ----------------------------------------------------------------------------
# One-time packing: transpose to (in, out), zero-pad the OUTPUT dims to the
# 128-lane grain (input K of layer 1 stays 784), cast matmul operands to bf16,
# pack all 5 biases into a single (8, 128) f32 tile.
# Zero-padded weight cols + zero bias lanes keep padded hidden lanes exactly 0
# through ReLU — keep this invariant if the packing changes.
# ----------------------------------------------------------------------------
def pack_params(params):
    (w1, b1), (w2, b2), (w3, b3), (w4, b4), (w5, b5) = params

    w1p = jnp.zeros((IN_FEATURES, H_PAD), jnp.float32).at[:, :HIDDEN].set(w1.T)

    wh = jnp.zeros((3, H_PAD, H_PAD), jnp.float32)
    wh = wh.at[0, :HIDDEN, :HIDDEN].set(w2.T)
    wh = wh.at[1, :HIDDEN, :HIDDEN].set(w3.T)
    wh = wh.at[2, :HIDDEN, :HIDDEN].set(w4.T)

    w5p = jnp.zeros((H_PAD, OUT_PAD), jnp.float32).at[:HIDDEN, :OUT_CLASSES].set(w5.T)

    bias = jnp.zeros((SUBLANE, LANE), jnp.float32)
    bias = bias.at[0, :HIDDEN].set(b1)
    bias = bias.at[1, :HIDDEN].set(b2)
    bias = bias.at[2, :HIDDEN].set(b3)
    bias = bias.at[3, :HIDDEN].set(b4)
    bias = bias.at[4, :OUT_CLASSES].set(b5)

    return (w1p.astype(jnp.bfloat16),
            wh.astype(jnp.bfloat16),
            w5p.astype(jnp.bfloat16),
            bias)


# ----------------------------------------------------------------------------
# Pallas kernel: full Net4 forward (5 linears + ReLU + masked log_softmax)
# ----------------------------------------------------------------------------
def net4_kernel(x_ref, w1_ref, wh_ref, w5_ref, b_ref, out_ref):
    b = b_ref[...]                                   # (8, 128)  f32

    # layer 1: in-kernel f32->bf16 cast of the x tile (hidden under the DMA),
    # bf16 MXU feed with f32 accumulation; K=784 (unpadded) is fine for the MXU.
    x = x_ref[...].astype(jnp.bfloat16)              # (TB, 784)
    h = jnp.dot(x, w1_ref[...], preferred_element_type=jnp.float32) + b[0:1, :]
    h = jnp.maximum(h, 0.0)

    # hidden layers 2-4 (stacked (3,128,128) bf16 weights); padded lanes stay 0.
    h = jnp.dot(h.astype(jnp.bfloat16), wh_ref[0],
                preferred_element_type=jnp.float32) + b[1:2, :]
    h = jnp.maximum(h, 0.0)
    h = jnp.dot(h.astype(jnp.bfloat16), wh_ref[1],
                preferred_element_type=jnp.float32) + b[2:3, :]
    h = jnp.maximum(h, 0.0)
    h = jnp.dot(h.astype(jnp.bfloat16), wh_ref[2],
                preferred_element_type=jnp.float32) + b[3:4, :]
    h = jnp.maximum(h, 0.0)

    # output layer (10 real classes in a lane-dense 128-wide slab)
    logits = jnp.dot(h.astype(jnp.bfloat16), w5_ref[...],
                     preferred_element_type=jnp.float32) + b[4:5, :]

    # mask padded logit lanes so they don't affect the normalization
    lane = jax.lax.broadcasted_iota(jnp.int32, logits.shape, 1)
    logits = jnp.where(lane < OUT_CLASSES, logits, -1e30)

    # log_softmax along dim=1 (per-row, so partial-block garbage rows stay local)
    m = jnp.max(logits, axis=1, keepdims=True)
    lse = jnp.log(jnp.sum(jnp.exp(logits - m), axis=1, keepdims=True)) + m
    out_ref[...] = (logits - lse).astype(out_ref.dtype)


def _choose_tile(rows):
    """Smallest tile count with TB <= TB_MAX; >=2 tiles when rows allow (v7x)."""
    n_tiles = _cdiv(rows, TB_MAX)
    if rows > SUBLANE:
        n_tiles = max(n_tiles, MIN_TILES)
    return _round_up(_cdiv(rows, n_tiles), SUBLANE)


def net4_forward(x, packed, out_dtype=jnp.float32):
    """x: (B, 1, 28, 28) float32 NCHW. packed: pack_params(...). -> (B, 10).

    out_dtype=jnp.bfloat16 halves output writeback if the caller can tolerate
    ~3 significant digits in the log-probs.
    """
    B = x.shape[0]
    xf = x.reshape(B, IN_FEATURES)          # flatten only: no K-pad, no dtype pass

    # Pad rows to the f32 sublane grain only when needed (<=7 rows, rare for
    # typical batch sizes); TB-level boundaries use Pallas partial last blocks.
    rows = _round_up(B, SUBLANE)
    if rows != B:
        xf = jnp.pad(xf, ((0, rows - B), (0, 0)))

    w1p, wh, w5p, bias = packed

    tb = _choose_tile(rows)
    grid = (_cdiv(rows, tb),)               # last block may be partial (row-local ops only)

    in_specs = [
        pl.BlockSpec((tb, IN_FEATURES), lambda i: (i, 0)),       # x tile (pipelined), 784 == full dim
        pl.BlockSpec((IN_FEATURES, H_PAD), lambda i: (0, 0)),    # w1 (resident)
        pl.BlockSpec((3, H_PAD, H_PAD), lambda i: (0, 0, 0)),    # w2..w4 (resident)
        pl.BlockSpec((H_PAD, OUT_PAD), lambda i: (0, 0)),        # w5 (resident)
        pl.BlockSpec((SUBLANE, LANE), lambda i: (0, 0)),         # biases (resident)
    ]
    out_spec = pl.BlockSpec((tb, OUT_PAD), lambda i: (i, 0))

    out_padded = pl.pallas_call(
        net4_kernel,
        out_shape=jax.ShapeDtypeStruct((rows, OUT_PAD), out_dtype),
        grid=grid,
        in_specs=in_specs,
        out_specs=out_spec,
        compiler_params=pltpu.CompilerParams(
            dimension_semantics=("parallel",),
            vmem_limit_bytes=32 * 1024 * 1024),
    )(xf, w1p, wh, w5p, bias)

    # Lane-dense 128-wide slab -> (B, 10).  A consumer that can read the slab
    # directly should take `out_padded` and fuse this slice to save writeback.
    return out_padded[:B, :OUT_CLASSES]


# ----------------------------------------------------------------------------
if __name__ == "__main__":
    key = jax.random.PRNGKey(0)
    kx, k1, k2, k3, k4, k5 = jax.random.split(key, 6)

    # small MNIST-like batch: (B=2, C=1, H=28, W=28) NCHW
    x = jax.random.normal(kx, (2, 1, 28, 28), dtype=jnp.float32)

    params = (
        make_supermask_linear_params(k1, IN_FEATURES, HIDDEN),
        make_supermask_linear_params(k2, HIDDEN, HIDDEN),
        make_supermask_linear_params(k3, HIDDEN, HIDDEN),
        make_supermask_linear_params(k4, HIDDEN, HIDDEN),
        make_supermask_linear_params(k5, HIDDEN, OUT_CLASSES),
    )
    packed = pack_params(params)

    out = net4_forward(x, packed)
    jax.block_until_ready(out)

    assert out.shape == (2, OUT_CLASSES)
    # sanity: rows of log_softmax should exp-sum to ~1
    assert jnp.allclose(jnp.sum(jnp.exp(out), axis=1), 1.0, atol=1e-3)

    print("KERNEL_OK")
</pallas_src>

<mosaic_0001>
module attributes {stable_mosaic.version = 11 : i64} {
  func.func @net4_kernel(%arg0: i32, %arg1: memref<8x784xf32, #tpu.memory_space<vmem>>, %arg2: memref<784x128xbf16, #tpu.memory_space<vmem>>, %arg3: memref<3x128x128xbf16, #tpu.memory_space<vmem>>, %arg4: memref<128x128xbf16, #tpu.memory_space<vmem>>, %arg5: memref<8x128xf32, #tpu.memory_space<vmem>>, %arg6: memref<8x128xf32, #tpu.memory_space<vmem>>) attributes {dimension_semantics = [#tpu.dimension_semantics<parallel>], iteration_bounds = array<i64: 1>, scalar_prefetch = 0 : i64, scratch_operands = 0 : i64, tpu.core_type = #tpu.core_type<tc>, window_params = [{transform_indices = @transform_0, window_bounds = array<i64: 8, 784>}, {pipeline_mode = #tpu.pipeline_mode<synchronous>, transform_indices = @transform_1, window_bounds = array<i64: 784, 128>}, {pipeline_mode = #tpu.pipeline_mode<synchronous>, transform_indices = @transform_2, window_bounds = array<i64: 3, 128, 128>}, {pipeline_mode = #tpu.pipeline_mode<synchronous>, transform_indices = @transform_3, window_bounds = array<i64: 128, 128>}, {pipeline_mode = #tpu.pipeline_mode<synchronous>, transform_indices = @transform_4, window_bounds = array<i64: 8, 128>}, {transform_indices = @transform_5, window_bounds = array<i64: 8, 128>}]} {
    %c0 = arith.constant 0 : index
    %c0_0 = arith.constant 0 : index
    %0 = vector.load %arg5[%c0, %c0_0] : memref<8x128xf32, #tpu.memory_space<vmem>>, vector<8x128xf32>
    %c0_1 = arith.constant 0 : index
    %c0_2 = arith.constant 0 : index
    %1 = vector.load %arg1[%c0_1, %c0_2] : memref<8x784xf32, #tpu.memory_space<vmem>>, vector<8x784xf32>
    %2 = arith.truncf %1 : vector<8x784xf32> to vector<8x784xbf16>
    %c0_3 = arith.constant 0 : index
    %c0_4 = arith.constant 0 : index
    %3 = vector.load %arg2[%c0_3, %c0_4] : memref<784x128xbf16, #tpu.memory_space<vmem>>, vector<784x128xbf16>
    %cst = arith.constant dense<0.000000e+00> : vector<8x128xf32>
    %4 = tpu.matmul %2, %3, %cst {dimension_numbers = #tpu.dot_dimension_numbers<[1], [0], [0], [1], [0, 0, 1, 1], [], []>} : vector<8x784xbf16>, vector<784x128xbf16>, vector<8x128xf32> -> vector<8x128xf32>
    %5 = vector.extract_strided_slice %0 {offsets = [0, 0], sizes = [1, 128], strides = [1, 1]} : vector<8x128xf32> to vector<1x128xf32>
    %6 = vector.broadcast %5 : vector<1x128xf32> to vector<8x128xf32>
    %7 = arith.addf %4, %6 : vector<8x128xf32>
    %cst_5 = arith.constant 0.000000e+00 : f32
    %8 = vector.broadcast %cst_5 : f32 to vector<8x128xf32>
    %9 = arith.maximumf %7, %8 : vector<8x128xf32>
    %10 = arith.truncf %9 : vector<8x128xf32> to vector<8x128xbf16>
    %c0_6 = arith.constant 0 : index
    %c0_7 = arith.constant 0 : index
    %c0_8 = arith.constant 0 : index
    %11 = vector.load %arg3[%c0_6, %c0_7, %c0_8] : memref<3x128x128xbf16, #tpu.memory_space<vmem>>, vector<1x128x128xbf16>
    %12 = vector.shape_cast %11 : vector<1x128x128xbf16> to vector<128x128xbf16>
    %cst_9 = arith.constant dense<0.000000e+00> : vector<8x128xf32>
    %13 = tpu.matmul %10, %12, %cst_9 {dimension_numbers = #tpu.dot_dimension_numbers<[1], [0], [0], [1], [0, 0, 1, 1], [], []>} : vector<8x128xbf16>, vector<128x128xbf16>, vector<8x128xf32> -> vector<8x128xf32>
    %14 = vector.extract_strided_slice %0 {offsets = [1, 0], sizes = [1, 128], strides = [1, 1]} : vector<8x128xf32> to vector<1x128xf32>
    %15 = vector.broadcast %14 : vector<1x128xf32> to vector<8x128xf32>
    %16 = arith.addf %13, %15 : vector<8x128xf32>
    %cst_10 = arith.constant 0.000000e+00 : f32
    %17 = vector.broadcast %cst_10 : f32 to vector<8x128xf32>
    %18 = arith.maximumf %16, %17 : vector<8x128xf32>
    %19 = arith.truncf %18 : vector<8x128xf32> to vector<8x128xbf16>
    %c1 = arith.constant 1 : index
    %c0_11 = arith.constant 0 : index
    %c0_12 = arith.constant 0 : index
    %20 = vector.load %arg3[%c1, %c0_11, %c0_12] : memref<3x128x128xbf16, #tpu.memory_space<vmem>>, vector<1x128x128xbf16>
    %21 = vector.shape_cast %20 : vector<1x128x128xbf16> to vector<128x128xbf16>
    %cst_13 = arith.constant dense<0.000000e+00> : vector<8x128xf32>
    %22 = tpu.matmul %19, %21, %cst_13 {dimension_numbers = #tpu.dot_dimension_numbers<[1], [0], [0], [1], [0, 0, 1, 1], [], []>} : vector<8x128xbf16>, vector<128x128xbf16>, vector<8x128xf32> -> vector<8x128xf32>
    %23 = vector.extract_strided_slice %0 {offsets = [2, 0], sizes = [1, 128], strides = [1, 1]} : vector<8x128xf32> to vector<1x128xf32>
    %24 = vector.broadcast %23 : vector<1x128xf32> to vector<8x128xf32>
    %25 = arith.addf %22, %24 : vector<8x128xf32>
    %cst_14 = arith.constant 0.000000e+00 : f32
    %26 = vector.broadcast %cst_14 : f32 to vector<8x128xf32>
    %27 = arith.maximumf %25, %26 : vector<8x128xf32>
    %28 = arith.truncf %27 : vector<8x128xf32> to vector<8x128xbf16>
    %c2 = arith.constant 2 : index
    %c0_15 = arith.constant 0 : index
    %c0_16 = arith.constant 0 : index
    %29 = vector.load %arg3[%c2, %c0_15, %c0_16] : memref<3x128x128xbf16, #tpu.memory_space<vmem>>, vector<1x128x128xbf16>
    %30 = vector.shape_cast %29 : vector<1x128x128xbf16> to vector<128x128xbf16>
    %cst_17 = arith.constant dense<0.000000e+00> : vector<8x128xf32>
    %31 = tpu.matmul %28, %30, %cst_17 {dimension_numbers = #tpu.dot_dimension_numbers<[1], [0], [0], [1], [0, 0, 1, 1], [], []>} : vector<8x128xbf16>, vector<128x128xbf16>, vector<8x128xf32> -> vector<8x128xf32>
    %32 = vector.extract_strided_slice %0 {offsets = [3, 0], sizes = [1, 128], strides = [1, 1]} : vector<8x128xf32> to vector<1x128xf32>
    %33 = vector.broadcast %32 : vector<1x128xf32> to vector<8x128xf32>
    %34 = arith.addf %31, %33 : vector<8x128xf32>
    %cst_18 = arith.constant 0.000000e+00 : f32
    %35 = vector.broadcast %cst_18 : f32 to vector<8x128xf32>
    %36 = arith.maximumf %34, %35 : vector<8x128xf32>
    %37 = arith.truncf %36 : vector<8x128xf32> to vector<8x128xbf16>
    %c0_19 = arith.constant 0 : index
    %c0_20 = arith.constant 0 : index
    %38 = vector.load %arg4[%c0_19, %c0_20] : memref<128x128xbf16, #tpu.memory_space<vmem>>, vector<128x128xbf16>
    %cst_21 = arith.constant dense<0.000000e+00> : vector<8x128xf32>
    %39 = tpu.matmul %37, %38, %cst_21 {dimension_numbers = #tpu.dot_dimension_numbers<[1], [0], [0], [1], [0, 0, 1, 1], [], []>} : vector<8x128xbf16>, vector<128x128xbf16>, vector<8x128xf32> -> vector<8x128xf32>
    %40 = vector.extract_strided_slice %0 {offsets = [4, 0], sizes = [1, 128], strides = [1, 1]} : vector<8x128xf32> to vector<1x128xf32>
    %41 = vector.broadcast %40 : vector<1x128xf32> to vector<8x128xf32>
    %42 = arith.addf %39, %41 : vector<8x128xf32>
    %43 = tpu.iota {dimensions = array<i32: 1>} : vector<8x128xi32>
    %c10_i32 = arith.constant 10 : i32
    %44 = vector.broadcast %c10_i32 : i32 to vector<8x128xi32>
    %45 = arith.cmpi slt, %43, %44 : vector<8x128xi32>
    %cst_22 = arith.constant -1.000000e+30 : f32
    %46 = vector.broadcast %cst_22 : f32 to vector<8x128xf32>
    %47 = arith.select %45, %42, %46 : vector<8x128xi1>, vector<8x128xf32>
    %cst_23 = arith.constant dense<0xFF800000> : vector<8xf32>
    %48 = vector.multi_reduction <maximumf>, %47, %cst_23 [1] : vector<8x128xf32> to vector<8xf32>
    %49 = vector.shape_cast %48 : vector<8xf32> to vector<8x1xf32>
    %50 = vector.broadcast %49 : vector<8x1xf32> to vector<8x128xf32>
    %51 = arith.subf %47, %50 : vector<8x128xf32>
    %52 = math.exp %51 : vector<8x128xf32>
    %cst_24 = arith.constant dense<0.000000e+00> : vector<8xf32>
    %53 = vector.multi_reduction <add>, %52, %cst_24 [1] : vector<8x128xf32> to vector<8xf32>
    %54 = vector.shape_cast %53 : vector<8xf32> to vector<8x1xf32>
    %55 = math.log %54 : vector<8x1xf32>
    %56 = arith.addf %55, %49 : vector<8x1xf32>
    %57 = vector.broadcast %56 : vector<8x1xf32> to vector<8x128xf32>
    %58 = arith.subf %47, %57 : vector<8x128xf32>
    %c0_25 = arith.constant 0 : index
    %c0_26 = arith.constant 0 : index
    %59 = vector.load %arg6[%c0_25, %c0_26] : memref<8x128xf32, #tpu.memory_space<vmem>>, vector<8x128xf32>
    tpu.vector_store %arg6[%c0_25, %c0_26], %58 {strides = array<i32>} : memref<8x128xf32, #tpu.memory_space<vmem>>, vector<8x128xf32>,
    return
  }
  func.func @transform_0(%arg0: i32) -> (i32, i32) {
    %c0_i32 = arith.constant 0 : i32
    %c0_i32_0 = arith.constant 0 : i32
    return %arg0, %c0_i32 : i32, i32
  }
  func.func @transform_1(%arg0: i32) -> (i32, i32) {
    %c0_i32 = arith.constant 0 : i32
    %c0_i32_0 = arith.constant 0 : i32
    %c0_i32_1 = arith.constant 0 : i32
    return %c0_i32, %c0_i32_0 : i32, i32
  }
  func.func @transform_2(%arg0: i32) -> (i32, i32, i32) {
    %c0_i32 = arith.constant 0 : i32
    %c0_i32_0 = arith.constant 0 : i32
    %c0_i32_1 = arith.constant 0 : i32
    %c0_i32_2 = arith.constant 0 : i32
    return %c0_i32, %c0_i32_0, %c0_i32_1 : i32, i32, i32
  }
  func.func @transform_3(%arg0: i32) -> (i32, i32) {
    %c0_i32 = arith.constant 0 : i32
    %c0_i32_0 = arith.constant 0 : i32
    %c0_i32_1 = arith.constant 0 : i32
    return %c0_i32, %c0_i32_0 : i32, i32
  }
  func.func @transform_4(%arg0: i32) -> (i32, i32) {
    %c0_i32 = arith.constant 0 : i32
    %c0_i32_0 = arith.constant 0 : i32
    %c0_i32_1 = arith.constant 0 : i32
    return %c0_i32, %c0_i32_0 : i32, i32
  }
  func.func @transform_5(%arg0: i32) -> (i32, i32) {
    %c0_i32 = arith.constant 0 : i32
    %c0_i32_0 = arith.constant 0 : i32
    return %arg0, %c0_i32 : i32, i32
  }
}

</mosaic_0001>

<bundles_post_ra>
// kernel: tpu_custom_call.1
= control target key start
LH: loop header
LB: loop body
LE: loop exit
PB: predicated region body
PF: predicated region fallthrough
CT: control target
= control target key end

     0   :  { %10 = vsyncpa [#allocation3], 0  ;;  %s1757_s0 = inlined_call_operand.hbm [shape: f32[8,784], index: 0, kind: input, shape index: {}]   ;;  %s1758_s1 = inlined_call_operand.hbm [shape: bf16[784,128], index: 1, kind: input, shape index: {}]   ;;  %s1759_s2 = inlined_call_operand.hbm [shape: bf16[3,128,128], index: 2, kind: input, shape index: {}]   ;;  %s1760_s3 = inlined_call_operand.hbm [shape: bf16[128,128], index: 3, kind: input, shape index: {}]   ;;  %s1761_s4 = inlined_call_operand.hbm [shape: f32[8,128], index: 4, kind: input, shape index: {}]   ;;  %s1762_s5 = inlined_call_operand.hbm [shape: f32[8,128], index: 5, kind: output, shape index: {}]  }
   0x1   :  { %11 = vsyncpa [#allocation6], 0 }
   0x2   :  { %12 = vsyncpa [#allocation9], 0 }
   0x3   :  { %13 = vsyncpa [#allocation4], 0  ;;  %s1631_s18 = smov [#allocation5]  }
   0x4   :  { %s29_s19 = sshll.u32 %s1631_s18, 4  ;;  %s30_s19 = int_to_ptr.vmem [resolvable:$true] %s29_s19 }
   0x5   :  { %s1511_s20 = scalar_lea.vmem %s30_s19, 6272  ;;  %p1516_p1 = scmp.lt.s32.totalorder %s30_s19, %s30_s19 }
   0x6   :  { %p1512_p0 = scmp.ne.s32.totalorder %s30_s19, %s1511_s20  ;;  %p1517_p2 = scmp.lt.s32.totalorder %s1511_s20, %s1511_s20 }
   0x8   :  { %p1518_p3 = por %p1517_p2, %p1516_p1 }
   0xa   :  { %p1519_p4 = pnand %p1518_p3, %p1512_p0 }
   0xc   :  { %1522 = shalt.err (!%p1519_p4)
}
   0xd   :  { %s1632_s21 = smov 64   ;;  %s1633_s22 = smov 4  }
   0xe   :  { %35 = dma.hbm_to_vmem [thread:$0]  %s1758_s1, 6272, %s30_s19, [#allocation6], %s1632_s21, %s1632_s21, %s1633_s22  }
   0xf   :  { %s1634_s25 = smov [#allocation8]   ;;  %s1635_s27 = smov [#allocation2]  }
  0x10   :  { %s53_s26 = sshll.u32 %s1634_s25, 4  ;;  %s20_s28 = sshll.u32 %s1635_s27, 4  ;;  %s54_s26 = int_to_ptr.vmem [resolvable:$true] %s53_s26  ;;  %s21_s28 = int_to_ptr.vmem [resolvable:$true] %s20_s28 }
  0x11   :  { %s1531_s29 = scalar_lea.vmem %s54_s26, 1024  ;;  %p1536_p6 = scmp.lt.s32.totalorder %s54_s26, %s54_s26 }
  0x12   :  { %p1532_p5 = scmp.ne.s32.totalorder %s54_s26, %s1531_s29  ;;  %p1537_p7 = scmp.lt.s32.totalorder %s1531_s29, %s1531_s29 }
  0x14   :  { %p1538_p8 = por %p1537_p7, %p1536_p6 }
  0x16   :  { %p1539_p9 = pnand %p1538_p8, %p1532_p5 }
  0x18   :  { %1542 = shalt.err (!%p1539_p9)
}
  0x19   :  { %59 = dma.hbm_to_vmem [thread:$0]  %s1760_s3, 1024, %s54_s26, [#allocation9], %s1632_s21, %s1632_s21, %s1633_s22  }
  0x1a   :  { %s1551_s1 = scalar_lea.vmem %s21_s28, 896  ;;  %p1556_p11 = scmp.lt.s32.totalorder %s21_s28, %s21_s28 }
  0x1b   :  { %p1552_p10 = scmp.ne.s32.totalorder %s21_s28, %s1551_s1  ;;  %p1557_p12 = scmp.lt.s32.totalorder %s1551_s1, %s1551_s1 }
  0x1d   :  { %p1558_p13 = por %p1557_p12, %p1556_p11 }
  0x1f   :  { %p1559_p0 = pnand %p1558_p13, %p1552_p10 }
  0x21   :  { %1562 = shalt.err (!%p1559_p0)
}
  0x22   :  { %23 = dma.hbm_to_vmem [thread:$0]  %s1757_s0, 896, %s21_s28, [#allocation3]  }
  0x23   :  { %s1636_s9 = smov [#allocation7]   ;;  %s1637_s11 = smov [#allocation10]  }
  0x24   :  { %s41_s10 = sshll.u32 %s1636_s9, 4  ;;  %s66_s12 = sshll.u32 %s1637_s11, 4  ;;  %s42_s10 = int_to_ptr.vmem [resolvable:$true] %s41_s10  ;;  %s67_s12 = int_to_ptr.vmem [resolvable:$true] %s66_s12 }
  0x25   :  { %s1571_s13 = scalar_lea.vmem %s42_s10, 3072  ;;  %p1576_p2 = scmp.lt.s32.totalorder %s42_s10, %s42_s10 }
  0x26   :  { %p1572_p1 = scmp.ne.s32.totalorder %s42_s10, %s1571_s13  ;;  %p1577_p3 = scmp.lt.s32.totalorder %s1571_s13, %s1571_s13 }
  0x28   :  { %p1578_p4 = por %p1577_p3, %p1576_p2 }
  0x2a   :  { %p1579_p5 = pnand %p1578_p4, %p1572_p1 }
  0x2c   :  { %1582 = shalt.err (!%p1579_p5)
}
  0x2d   :  { %47 = dma.hbm_to_vmem [thread:$0]  %s1759_s2, 3072, %s42_s10, [#allocation6], %s1632_s21, %s1632_s21, %s1633_s22  }
  0x2e   :  { %s1591_s0 = scalar_lea.vmem %s67_s12, 128  ;;  %p1596_p7 = scmp.lt.s32.totalorder %s67_s12, %s67_s12 }
  0x2f   :  { %p1592_p6 = scmp.ne.s32.totalorder %s67_s12, %s1591_s0  ;;  %p1597_p8 = scmp.lt.s32.totalorder %s1591_s0, %s1591_s0 }
  0x31   :  { %p1598_p9 = por %p1597_p8, %p1596_p7 }
  0x33   :  { %p1599_p10 = pnand %p1598_p9, %p1592_p6 }
  0x35   :  { %1602 = shalt.err (!%p1599_p10)
}
  0x36   :  { %69 = dma.hbm_to_vmem [thread:$0]  %s1761_s4, 128, %s67_s12, [#allocation9]  }
  0x37   :  { %1623 = dma.done.wait [#allocation3], 896  }
  0x38   :  { %1624 = vsyncadd [#allocation3], 4294966400 }
  0x39   :  { %1625 = dma.done.wait [#allocation6], 9344  }
  0x3a   :  { %1626 = vsyncadd [#allocation6], 4294957952 }
  0x3b   :  { %1627 = dma.done.wait [#allocation9], 1152  }
  0x3c   :  { %1628 = vsyncadd [#allocation9], 4294966144  ;;  %v1418_v0 = vld [vmem:[#allocation5 + $0x78] sm:$0xff]   ;;  %v1422_v4 = vld [vmem:[#allocation5 + $0x70] sm:$0xff]   ;;  %v1638_v44 = vmov 0.0   ;;  %vm1639_vm0 = vmmov 0  }
  0x3d   :  { %v1419_v1 = vld [vmem:[#allocation5 + $0x38] sm:$0xff]   ;;  %1218 = vmatprep.subr.bf16.mxu0 %v1418_v0  ;;  %v1423_v5 = vld [vmem:[#allocation5 + $0x30] sm:$0xff]   ;;  %v1426_v8 = vld [vmem:[#allocation5 + $0x68] sm:$0xff]   ;;  %vm497_vm1 = vcmask 130048   ;;  %s1640_s2 = smov [#allocation11]  }
  0x3e   :  { %v1420_v2 = vld [vmem:[#allocation5 + $0xf8] sm:$0xff]   ;;  %1219 = vmatpush3.bf16.msra.mxu0 %v1419_v1  ;;  %v1424_v6 = vld [vmem:[#allocation5 + $0xf0] sm:$0xff]   ;;  %v1427_v9 = vld [vmem:[#allocation5 + $0x28] sm:$0xff]   ;;  %s1125_s4 = sshll.u32 %s1640_s2, 4  ;;  %s1126_s4 = int_to_ptr.vmem [resolvable:$true] %s1125_s4 }
  0x3f   :  { %v1421_v3 = vld [vmem:[#allocation5 + $0xb8] sm:$0xff]   ;;  %1240 = vmatprep.subr.bf16.mxu1 %v1420_v2  ;;  %1220 = vmatprep.subr.bf16.mxu0 %v1422_v4  ;;  %v1425_v7 = vld [vmem:[#allocation5 + $0xb0] sm:$0xff]   ;;  %v1428_v10 = vld [vmem:[#allocation5 + $0xe8] sm:$0xff]   ;;  %s1603_s17 = scalar_lea.vmem %s1126_s4, 128  ;;  %p1608_p12 = scmp.lt.s32.totalorder %s1126_s4, %s1126_s4 }
  0x40   :  { %1241 = vmatpush3.bf16.msra.mxu1 %v1421_v3  ;;  %v1429_v11 = vld [vmem:[#allocation5 + $0xa8] sm:$0xff]   ;;  %v1430_v12 = vld [vmem:[#allocation5 + $0x60] sm:$0xff]   ;;  %v1434_v16 = vld [vmem:[#allocation5 + $0x58] sm:$0xff]   ;;  %p1604_p11 = scmp.ne.s32.totalorder %s1126_s4, %s1603_s17  ;;  %p1609_p13 = scmp.lt.s32.totalorder %s1603_s17, %s1603_s17 }
  0x41   :  { %1242 = vmatprep.subr.bf16.mxu1 %v1424_v6  ;;  %v1431_v13 = vld [vmem:[#allocation5 + $0x20] sm:$0xff]   ;;  %v1435_v17 = vld [vmem:[#allocation5 + $0x18] sm:$0xff]   ;;  %v1438_v20 = vld [vmem:[#allocation5 + $0x50] sm:$0xff]  }
  0x42   :  { %1221 = vmatpush3.bf16.msra.mxu0 %v1423_v5  ;;  %v1432_v14 = vld [vmem:[#allocation5 + $0xe0] sm:$0xff]   ;;  %v1436_v18 = vld [vmem:[#allocation5 + $0xd8] sm:$0xff]   ;;  %v1439_v21 = vld [vmem:[#allocation5 + $0x10] sm:$0xff]   ;;  %p1610_p0 = por %p1609_p13, %p1608_p12 }
  0x43   :  { %1222 = vmatprep.subr.bf16.mxu0 %v1426_v8  ;;  %v1433_v15 = vld [vmem:[#allocation5 + $0xa0] sm:$0xff]   ;;  %v1437_v19 = vld [vmem:[#allocation5 + $0x98] sm:$0xff]   ;;  %v1440_v22 = vld [vmem:[#allocation5 + $0xd0] sm:$0xff]  }
  0x44   :  { %1243 = vmatpush3.bf16.msra.mxu1 %v1425_v7  ;;  %v1441_v23 = vld [vmem:[#allocation5 + $0x90] sm:$0xff]   ;;  %v1442_v24 = vld [vmem:[#allocation5 + $0x48] sm:$0xff]   ;;  %v1446_v28 = vld [vmem:[#allocation5 + $0x40] sm:$0xff]   ;;  %p1611_p1 = pnand %p1610_p0, %p1604_p11 }
  0x45   :  { %1244 = vmatprep.subr.bf16.mxu1 %v1428_v10  ;;  %v1443_v25 = vld [vmem:[#allocation5 + $0x8] sm:$0xff]   ;;  %v1447_v29 = vld [vmem:[#allocation5] sm:$0xff]   ;;  %v88_v31 = vld [vmem:[#allocation2 + $0x8] sm:$0xff] }
  0x46   :  { %1223 = vmatpush3.bf16.msra.mxu0 %v1427_v9  ;;  %v1444_v26 = vld [vmem:[#allocation5 + $0xc8] sm:$0xff]   ;;  %v1448_v30 = vld [vmem:[#allocation5 + $0xc0] sm:$0xff]   ;;  %v95_v32 = vpack.c.bf16 %v88_v31, %v88_v31  ;;  %v1450_v36 = vld [vmem:[#allocation5 + $0x178] sm:$0xff]  }
  0x47   :  { %1224 = vmatprep.subr.bf16.mxu0 %v1430_v12  ;;  %v1445_v27 = vld [vmem:[#allocation5 + $0x88] sm:$0xff]   ;;  %v1449_v33 = vld [vmem:[#allocation5 + $0x80] sm:$0xff]   ;;  %v1451_v39 = vld [vmem:[#allocation5 + $0x138] sm:$0xff]  }
  0x48   :  { %1245 = vmatpush3.bf16.msra.mxu1 %v1429_v11  ;;  %v87_v34 = vld [vmem:[#allocation2] sm:$0xff]  ;;  %v90_v37 = vld [vmem:[#allocation2 + $0x18] sm:$0xff]  ;;  %533 = vmatprep.mubr.bf16.mxu0 %v95_v32  ;;  %v89_v40 = vld [vmem:[#allocation2 + $0x10] sm:$0xff] }
  0x49   :  { %1246 = vmatprep.subr.bf16.mxu1 %v1432_v14  ;;  %v94_v35 = vpack.c.bf16 %v87_v34, %v87_v34  ;;  %v97_v38 = vpack.c.bf16 %v90_v37, %v90_v37  ;;  %v96_v41 = vpack.c.bf16 %v89_v40, %v89_v40  ;;  %v1452_v42 = vld [vmem:[#allocation5 + $0x170] sm:$0xff]   ;;  %v1454_v45 = vld [vmem:[#allocation5 + $0x168] sm:$0xff]   ;;  %v1456_v47 = vld [vmem:[#allocation5 + $0x160] sm:$0xff]  }
  0x4a   :  { %1225 = vmatpush3.bf16.msra.mxu0 %v1431_v13  ;;  %v1453_v43 = vld [vmem:[#allocation5 + $0x130] sm:$0xff]   ;;  %v1455_v46 = vld [vmem:[#allocation5 + $0x128] sm:$0xff]   ;;  %v1457_v48 = vld [vmem:[#allocation5 + $0x120] sm:$0xff]  }
  0x4b   :  { %1226 = vmatprep.subr.bf16.mxu0 %v1434_v16  ;;  %573 = vmatprep.mubr.bf16.mxu1 %v97_v38  ;;  %v1458_v49 = vld [vmem:[#allocation5 + $0x158] sm:$0xff]   ;;  %v1460_v51 = vld [vmem:[#allocation5 + $0x150] sm:$0xff]   ;;  %v1466_v53 = vld [vmem:[#allocation5 + $0x180] sm:$0xff]  }
  0x4c   :  { %1247 = vmatpush3.bf16.msra.mxu1 %v1433_v15  ;;  %v1459_v50 = vld [vmem:[#allocation5 + $0x118] sm:$0xff]   ;;  %v1461_v52 = vld [vmem:[#allocation5 + $0x110] sm:$0xff]   ;;  %v1462_v55 = vld [vmem:[#allocation5 + $0x148] sm:$0xff]  }
  0x4d   :  { %1248 = vmatprep.subr.bf16.mxu1 %v1436_v18  ;;  %v92_v54 = vld [vmem:[#allocation2 + $0x28] sm:$0xff]  ;;  %v93_v57 = vld [vmem:[#allocation2 + $0x30] sm:$0xff]  ;;  %v1463_v59 = vld [vmem:[#allocation5 + $0x108] sm:$0xff]  }
  0x4e   :  { %1227 = vmatpush3.bf16.msra.mxu0 %v1435_v17  ;;  %v99_v56 = vpack.c.bf16 %v92_v54, %v92_v54  ;;  %v100_v58 = vpack.c.bf16 %v93_v57, %v93_v57  ;;  %v1464_v60 = vld [vmem:[#allocation5 + $0x140] sm:$0xff]   ;;  %v91_v62 = vld [vmem:[#allocation2 + $0x20] sm:$0xff]  ;;  %v1468_v1 = vld [vmem:[#allocation7 + $0x30] sm:$0xff]  }
  0x4f   :  { %1228 = vmatprep.subr.bf16.mxu0 %v1438_v20  ;;  %v1465_v61 = vld [vmem:[#allocation5 + $0x100] sm:$0xff]   ;;  %v98_v63 = vpack.c.bf16 %v91_v62, %v91_v62  ;;  %v1469_v2 = vld [vmem:[#allocation7 + $0x28] sm:$0xff]   ;;  %v1470_v3 = vld [vmem:[#allocation7 + $0x20] sm:$0xff]  }
  0x50   :  { %1249 = vmatpush3.bf16.msra.mxu1 %v1437_v19  ;;  %v1467_v0 = vld [vmem:[#allocation7 + $0x38] sm:$0xff]   ;;  %v1472_v5 = vld [vmem:[#allocation7 + $0x10] sm:$0xff]   ;;  %v1473_v6 = vld [vmem:[#allocation7 + $0x8] sm:$0xff]  }
  0x51   :  { %1250 = vmatprep.subr.bf16.mxu1 %v1440_v22  ;;  %v1471_v4 = vld [vmem:[#allocation7 + $0x18] sm:$0xff]   ;;  %v1474_v7 = vld [vmem:[#allocation7] sm:$0xff]   ;;  %v1476_v9 = vld [vmem:[#allocation7 + $0x70] sm:$0xff]   ;;  %v199_v22 = vlaneseq }
  0x52   :  { %1229 = vmatpush3.bf16.msra.mxu0 %v1439_v21  ;;  %v1475_v8 = vld [vmem:[#allocation7 + $0x78] sm:$0xff]   ;;  %v1477_v10 = vld [vmem:[#allocation7 + $0x68] sm:$0xff]   ;;  %v1478_v11 = vld [vmem:[#allocation7 + $0x60] sm:$0xff]  }
  0x53   :  { %1230 = vmatprep.subr.bf16.mxu0 %v1442_v24  ;;  %v1479_v12 = vld [vmem:[#allocation7 + $0x58] sm:$0xff]   ;;  %v1480_v13 = vld [vmem:[#allocation7 + $0x50] sm:$0xff]   ;;  %v1489_v62 = vld [vmem:[#allocation7 + $0x88] sm:$0xff]  }
  0x54   :  { %1251 = vmatpush3.bf16.msra.mxu1 %v1441_v23  ;;  %v1719_v23 = vshrl.u32 %v199_v22, 7 }
  0x55   :  { %1252 = vmatprep.subr.bf16.mxu1 %v1444_v26 }
  0x56   :  { %1231 = vmatpush3.bf16.msra.mxu0 %v1443_v25  ;;  %v201_v26 = vsub.s32 0, %v1719_v23 }
  0x57   :  { %1232 = vmatprep.subr.bf16.mxu0 %v1446_v28 }
  0x58   :  { %1253 = vmatpush3.bf16.msra.mxu1 %v1445_v27  ;;  %v1722_v27 = vld [vmem:[#allocation10] sm:$0xff] }
  0x59   :  { %1254 = vmatprep.subr.bf16.mxu1 %v1448_v30  ;;  %v202_v30 = vrot.slane %v1722_v27, %v201_v26 }
  0x5a   :  { %1233 = vmatpush3.bf16.msra.mxu0 %v1447_v29 }
  0x5b   :  { %1262 = vmatprep.subr.bf16.mxu0 %v1450_v36 }
  0x5c   :  { %1255 = vmatpush3.bf16.msra.mxu1 %v1449_v33 }
  0x5d   :  { %534 = vmatmul.mubr.bf16.vlgmr.msra.gmra.mxu0 %v94_v35  ;;  %1322 = vmatprep.subr.bf16.mxu1 %v1638_v44 }
  0x5e   :  { %1263 = vmatpush3.bf16.msra.mxu0 %v1451_v39  ;;  %613 = vmatprep.mubr.bf16.mxu0 %v99_v56 }
  0x5f   :  { %574 = vmatmul.mubr.bf16.vlgmr.msra.gmra.mxu1 %v96_v41  ;;  %1264 = vmatprep.subr.bf16.mxu0 %v1452_v42 }
  0x60   :  { %1324 = vmatprep.mubr.msk.bf16.mxu1 %vm1639_vm0, %v1638_v44  ;;  %1323 = vmatpush3.bf16.msra.mxu1 %v1466_v53  ;;  %v681_v53 = vsub.s32 1, %v1719_v23 }
  0x61   :  { %1328 = vmatprep.subr.bf16.mxu1 %v1638_v44 }
  0x62   :  { %1265 = vmatpush3.bf16.msra.mxu0 %v1453_v43  ;;  %v682_v54 = vrot.slane %v1722_v27, %v681_v53 }
  0x63   :  { %1266 = vmatprep.subr.bf16.mxu0 %v1454_v45  ;;  %v1481_v45 = vld [vmem:[#allocation7 + $0x48] sm:$0xff]  }
  0x66   :  { %1267 = vmatpush3.bf16.msra.mxu0 %v1455_v46  ;;  %v1482_v46 = vld [vmem:[#allocation7 + $0x40] sm:$0xff]  }
  0x67   :  { %1268 = vmatprep.subr.bf16.mxu0 %v1456_v47  ;;  %1325 = vmatmul.mubr.msk.bf16.vlgmr.msra.gmra.mxu1 %vm497_vm1, %v100_v58  ;;  %v1483_v47 = vld [vmem:[#allocation7 + $0xb8] sm:$0xff]  }
  0x68   :  { %1344 = vmatprep.mubr.msk.bf16.mxu1 %vm1639_vm0, %v1638_v44  ;;  %1329 = vmatpush3.bf16.msra.mxu1 %v1467_v0  ;;  %v1491_v0 = vld [vmem:[#allocation8 + $0x38] sm:$0xff]  }
  0x69   :  { %1330 = vmatprep.subr.bf16.mxu1 %v1638_v44 }
  0x6a   :  { %1269 = vmatpush3.bf16.msra.mxu0 %v1457_v48  ;;  %v1484_v48 = vld [vmem:[#allocation7 + $0xb0] sm:$0xff]  }
  0x6b   :  { %1270 = vmatprep.subr.bf16.mxu0 %v1458_v49  ;;  %v1485_v49 = vld [vmem:[#allocation7 + $0xa8] sm:$0xff]  }
  0x6c   :  { %1331 = vmatpush3.bf16.msra.mxu1 %v1468_v1  ;;  %v1492_v1 = vld [vmem:[#allocation8 + $0x30] sm:$0xff]  }
  0x6d   :  { %1332 = vmatprep.subr.bf16.mxu1 %v1638_v44 }
  0x6e   :  { %1271 = vmatpush3.bf16.msra.mxu0 %v1459_v50  ;;  %v1486_v50 = vld [vmem:[#allocation7 + $0xa0] sm:$0xff]  }
  0x6f   :  { %1272 = vmatprep.subr.bf16.mxu0 %v1460_v51  ;;  %v1487_v51 = vld [vmem:[#allocation7 + $0x98] sm:$0xff]  }
  0x70   :  { %1333 = vmatpush3.bf16.msra.mxu1 %v1469_v2  ;;  %v1493_v2 = vld [vmem:[#allocation8 + $0x28] sm:$0xff]  }
  0x71   :  { %1334 = vmatprep.subr.bf16.mxu1 %v1638_v44 }
  0x72   :  { %1273 = vmatpush3.bf16.msra.mxu0 %v1461_v52  ;;  %v1488_v52 = vld [vmem:[#allocation7 + $0x90] sm:$0xff]  }
  0x73   :  { %1274 = vmatprep.subr.bf16.mxu0 %v1462_v55 }
  0x74   :  { %1335 = vmatpush3.bf16.msra.mxu1 %v1470_v3  ;;  %v1494_v3 = vld [vmem:[#allocation8 + $0x20] sm:$0xff]  }
  0x75   :  { %1336 = vmatprep.subr.bf16.mxu1 %v1638_v44 }
  0x76   :  { %1275 = vmatpush3.bf16.msra.mxu0 %v1463_v59 }
  0x77   :  { %1276 = vmatprep.subr.bf16.mxu0 %v1464_v60 }
  0x78   :  { %1337 = vmatpush3.bf16.msra.mxu1 %v1471_v4  ;;  %v1495_v4 = vld [vmem:[#allocation8 + $0x18] sm:$0xff]  }
  0x79   :  { %1338 = vmatprep.subr.bf16.mxu1 %v1638_v44 }
  0x7a   :  { %1277 = vmatpush3.bf16.msra.mxu0 %v1465_v61 }
  0x7b   :  { %1348 = vmatprep.subr.bf16.mxu0 %v1638_v44 }
  0x7c   :  { %1339 = vmatpush3.bf16.msra.mxu1 %v1472_v5  ;;  %v1496_v5 = vld [vmem:[#allocation8 + $0x10] sm:$0xff]  }
  0x7d   :  { %614 = vmatmul.mubr.bf16.vlgmr.msra.gmra.mxu0 %v98_v63  ;;  %1340 = vmatprep.subr.bf16.mxu1 %v1638_v44  ;;  %v1490_v63 = vld [vmem:[#allocation7 + $0x80] sm:$0xff]  }
  0x7e   :  { %1364 = vmatprep.mubr.msk.bf16.mxu0 %vm1639_vm0, %v1638_v44  ;;  %1349 = vmatpush3.bf16.msra.mxu0 %v1475_v8 }
  0x7f   :  { %1350 = vmatprep.subr.bf16.mxu0 %v1638_v44 }
  0x80   :  { %1341 = vmatpush3.bf16.msra.mxu1 %v1473_v6  ;;  %v792_v6 = vsub.s32 2, %v1719_v23 }
  0x81   :  { %1342 = vmatprep.subr.bf16.mxu1 %v1638_v44 }
  0x82   :  { %1351 = vmatpush3.bf16.msra.mxu0 %v1476_v9 }
  0x83   :  { %1352 = vmatprep.subr.bf16.mxu0 %v1638_v44 }
  0x84   :  { %1343 = vmatpush3.bf16.msra.mxu1 %v1474_v7  ;;  %v793_v7 = vrot.slane %v1722_v27, %v792_v6 }
  0x85   :  { %1368 = vmatprep.subr.bf16.mxu1 %v1638_v44 }
  0x86   :  { %1353 = vmatpush3.bf16.msra.mxu0 %v1477_v10 }
  0x87   :  { %1354 = vmatprep.subr.bf16.mxu0 %v1638_v44 }
  0x8a   :  { %1355 = vmatpush3.bf16.msra.mxu0 %v1478_v11 }
  0x8b   :  { %1356 = vmatprep.subr.bf16.mxu0 %v1638_v44 }
  0x8e   :  { %1357 = vmatpush3.bf16.msra.mxu0 %v1479_v12 }
  0x8f   :  { %1358 = vmatprep.subr.bf16.mxu0 %v1638_v44 }
  0x92   :  { %1359 = vmatpush3.bf16.msra.mxu0 %v1480_v13 }
  0x93   :  { %1360 = vmatprep.subr.bf16.mxu0 %v1638_v44 }
  0x96   :  { %1361 = vmatpush3.bf16.msra.mxu0 %v1481_v45 }
  0x97   :  { %1362 = vmatprep.subr.bf16.mxu0 %v1638_v44 }
  0x9a   :  { %1363 = vmatpush3.bf16.msra.mxu0 %v1482_v46 }
  0x9b   :  { %1388 = vmatprep.subr.bf16.mxu0 %v1638_v44 }
 0x11d   :  { %v1234_v14 = vpop.f32.mrf.mxu0 }
 0x11f   :  { %v1235_v15 = vpop.f32.mrf.mxu0  ;;  %v1256_v16 = vpop.f32.mrf.mxu1 }
 0x120   :  { %v1236_v31 = vadd.f32 %v1235_v15, %v1234_v14  ;;  %v1497_v15 = vld [vmem:[#allocation8 + $0x8] sm:$0xff]  }
 0x121   :  { %v1237_v17 = vpop.f32.mrf.mxu0  ;;  %v1257_v18 = vpop.f32.mrf.mxu1 }
 0x122   :  { %v536_v32 = vadd.f32 %v1236_v31, %v202_v30  ;;  %v1258_v33 = vadd.f32 %v1257_v18, %v1256_v16  ;;  %v1498_v16 = vld [vmem:[#allocation8] sm:$0xff]   ;;  %v903_v17 = vsub.s32 3, %v1719_v23  ;;  %v1104_v30 = vand.u32 127, %v199_v22 }
 0x123   :  { %v1238_v19 = vpop.f32.mrf.mxu0  ;;  %v1259_v20 = vpop.f32.mrf.mxu1 }
 0x124   :  { %v576_v36 = vadd.f32 %v1258_v33, %v536_v32  ;;  %v904_v18 = vrot.slane %v1722_v27, %v903_v17  ;;  %vm1105_vm2 = vcmp.lt.s32.totalorder %v1104_v30, 10 }
 0x125   :  { %v1260_v21 = vpop.f32.mrf.mxu1 }
 0x127   :  { %v655_v24 = vpop.f32.mrf.mxu1 }
 0x129   :  { %v1326_v25 = vpop.f32.mrf.mxu1 }
 0x12b   :  { %v658_v28 = vpop.f32.mrf.mxu1 }
 0x12d   :  { %v1327_v29 = vpop.f32.mrf.mxu1 }
 0x12e   :  { %v1013_v29 = vsub.s32 4, %v1719_v23 }
 0x13d   :  { %v1278_v34 = vpop.f32.mrf.mxu0 }
 0x13f   :  { %v1279_v35 = vpop.f32.mrf.mxu0 }
 0x140   :  { %v1280_v37 = vadd.f32 %v1279_v35, %v1278_v34 }
 0x141   :  { %v1281_v38 = vpop.f32.mrf.mxu0 }
 0x142   :  { %v616_v39 = vadd.f32 %v1280_v37, %v576_v36 }
 0x143   :  { %v1282_v40 = vpop.f32.mrf.mxu0 }
 0x144   :  { %v656_v41 = vadd.f32 %v655_v24, %v616_v39 }
 0x146   :  { %v661_v42 = vmax.f32 %v656_v41, 0.0 }
 0x148   :  { %v662_v43 = vpack.c.bf16 %v661_v42, %v661_v42 }
 0x14a   :  { %1345 = vmatmul.mubr.bf16.vlgmr.msra.gmra.mxu1 %v662_v43 }
 0x14b   :  { %1384 = vmatprep.mubr.msk.bf16.mxu1 %vm1639_vm0, %v1638_v44  ;;  %1369 = vmatpush3.bf16.msra.mxu1 %v1483_v47 }
 0x14c   :  { %1370 = vmatprep.subr.bf16.mxu1 %v1638_v44 }
 0x14f   :  { %1371 = vmatpush3.bf16.msra.mxu1 %v1484_v48 }
 0x150   :  { %1372 = vmatprep.subr.bf16.mxu1 %v1638_v44 }
 0x153   :  { %1373 = vmatpush3.bf16.msra.mxu1 %v1485_v49 }
 0x154   :  { %1374 = vmatprep.subr.bf16.mxu1 %v1638_v44 }
 0x157   :  { %1375 = vmatpush3.bf16.msra.mxu1 %v1486_v50 }
 0x158   :  { %1376 = vmatprep.subr.bf16.mxu1 %v1638_v44 }
 0x15b   :  { %1377 = vmatpush3.bf16.msra.mxu1 %v1487_v51 }
 0x15c   :  { %1378 = vmatprep.subr.bf16.mxu1 %v1638_v44 }
 0x15f   :  { %1379 = vmatpush3.bf16.msra.mxu1 %v1488_v52 }
 0x160   :  { %1380 = vmatprep.subr.bf16.mxu1 %v1638_v44 }
 0x163   :  { %1381 = vmatpush3.bf16.msra.mxu1 %v1489_v62 }
 0x164   :  { %1382 = vmatprep.subr.bf16.mxu1 %v1638_v44 }
 0x167   :  { %1383 = vmatpush3.bf16.msra.mxu1 %v1490_v63 }
 0x20a   :  { %v765_v55 = vpop.f32.mrf.mxu1 }
 0x20b   :  { %v766_v56 = vadd.f32 %v765_v55, %v682_v54 }
 0x20c   :  { %v1346_v57 = vpop.f32.mrf.mxu1 }
 0x20d   :  { %v771_v58 = vmax.f32 %v766_v56, 0.0 }
 0x20e   :  { %v768_v59 = vpop.f32.mrf.mxu1 }
 0x20f   :  { %v772_v60 = vpack.c.bf16 %v771_v58, %v771_v58 }
 0x210   :  { %v1347_v61 = vpop.f32.mrf.mxu1 }
 0x211   :  { %1365 = vmatmul.mubr.bf16.vlgmr.msra.gmra.mxu0 %v772_v60 }
 0x212   :  { %1404 = vmatprep.mubr.msk.bf16.mxu0 %vm1639_vm0, %v1638_v44  ;;  %1389 = vmatpush3.bf16.msra.mxu0 %v1491_v0 }
 0x213   :  { %1390 = vmatprep.subr.bf16.mxu0 %v1638_v44 }
 0x216   :  { %1391 = vmatpush3.bf16.msra.mxu0 %v1492_v1 }
 0x217   :  { %1392 = vmatprep.subr.bf16.mxu0 %v1638_v44 }
 0x21a   :  { %1393 = vmatpush3.bf16.msra.mxu0 %v1493_v2 }
 0x21b   :  { %1394 = vmatprep.subr.bf16.mxu0 %v1638_v44 }
 0x21e   :  { %1395 = vmatpush3.bf16.msra.mxu0 %v1494_v3 }
 0x21f   :  { %1396 = vmatprep.subr.bf16.mxu0 %v1638_v44 }
 0x222   :  { %1397 = vmatpush3.bf16.msra.mxu0 %v1495_v4 }
 0x223   :  { %1398 = vmatprep.subr.bf16.mxu0 %v1638_v44 }
 0x226   :  { %1399 = vmatpush3.bf16.msra.mxu0 %v1496_v5 }
 0x227   :  { %1400 = vmatprep.subr.bf16.mxu0 %v1638_v44 }
 0x22a   :  { %1401 = vmatpush3.bf16.msra.mxu0 %v1497_v15 }
 0x22b   :  { %1402 = vmatprep.subr.bf16.mxu0 %v1638_v44  ;;  %v1014_v44 = vrot.slane %v1722_v27, %v1013_v29 }
 0x22e   :  { %1403 = vmatpush3.bf16.msra.mxu0 %v1498_v16 }
 0x2d1   :  { %v876_v8 = vpop.f32.mrf.mxu0 }
 0x2d2   :  { %v877_v9 = vadd.f32 %v876_v8, %v793_v7 }
 0x2d3   :  { %v1366_v10 = vpop.f32.mrf.mxu0 }
 0x2d4   :  { %v882_v11 = vmax.f32 %v877_v9, 0.0 }
 0x2d5   :  { %v879_v12 = vpop.f32.mrf.mxu0 }
 0x2d6   :  { %v883_v13 = vpack.c.bf16 %v882_v11, %v882_v11 }
 0x2d7   :  { %v1367_v14 = vpop.f32.mrf.mxu0 }
 0x2d8   :  { %1385 = vmatmul.mubr.bf16.vlgmr.msra.gmra.mxu1 %v883_v13 }
 0x398   :  { %v987_v19 = vpop.f32.mrf.mxu1 }
 0x399   :  { %v988_v20 = vadd.f32 %v987_v19, %v904_v18 }
 0x39a   :  { %v1386_v21 = vpop.f32.mrf.mxu1 }
 0x39b   :  { %v993_v24 = vmax.f32 %v988_v20, 0.0 }
 0x39c   :  { %v990_v25 = vpop.f32.mrf.mxu1 }
 0x39d   :  { %v994_v26 = vpack.c.bf16 %v993_v24, %v993_v24 }
 0x39e   :  { %v1387_v28 = vpop.f32.mrf.mxu1 }
 0x39f   :  { %1405 = vmatmul.mubr.bf16.vlgmr.msra.gmra.mxu0 %v994_v26 }
 0x45f   :  { %v1097_v31 = vpop.f32.mrf.mxu0 }
 0x460   :  { %v1098_v32 = vadd.f32 %v1097_v31, %v1014_v44 }
 0x461   :  { %v1406_v33 = vpop.f32.mrf.mxu0 }
 0x462   :  { %v1106_v34 = vsel %vm1105_vm2, %v1098_v32, -1e+30 }
 0x463   :  { %1107 = vmax.xlane.f32.xlu0 %v1106_v34  ;;  %v1100_v35 = vpop.f32.mrf.mxu0 }
 0x465   :  { %v1407_v36 = vpop.f32.mrf.mxu0 }
 0x4ec   :  { %v1108_v37 = vpop.xlane.xlu0 %1107 }
 0x4ed   :  { %v1109_v38 = vsub.f32 %v1106_v34, %v1108_v37 }
 0x4ef   :  { %v1110_v39 = vmul.f32 1.442695, %v1109_v38 }
 0x4f1   :  { %1499 = vpow2.f32 %v1110_v39 }
 0x4fe   :  { %v1500_v40 = vpop.eup %1499 }
 0x4ff   :  { %1112 = vadd.xlane.f32.xlu0 %v1500_v40 }
 0x588   :  { %v1113_v41 = vpop.xlane.xlu0 %1112 }
 0x589   :  { %1501 = vlog2.f32 %v1113_v41 }
 0x596   :  { %v1502_v23 = vpop.eup %1501 }
 0x597   :  { %v1115_v22 = vmul.f32 0.6931472, %v1502_v23 }
 0x599   :  { %v1116_v27 = vadd.f32 %v1115_v22, %v1108_v37 }
 0x59b   :  { %v1117_v42 = vsub.f32 %v1106_v34, %v1116_v27 }
 0x59d   :  { %1118 = vst [vmem:[#allocation11] sm:$0xff] %v1117_v42 }
 0x59e   :  { %1614 = shalt.err (!%p1611_p1)
}
 0x59f   :  { %1128 = dma.vmem_to_hbm [thread:$0]  %s1126_s4, 128, %s1762_s5, [#allocation4]  }
 0x5a0   :  { %1629 = dma.done.wait [#allocation4], 128  }
 0x5a1   :  { %1630 = vsyncadd [#allocation4], 4294967168 }
 0x5a2   :  { %1132 = vsyncpa [#allocation3], 1 }
 0x5a3   :  { %1133 = vsyncpa [#allocation6], 1 }
 0x5a4   :  { %1134 = vsyncpa [#allocation9], 1 }
 0x5a5   :  { %1135 = vsyncpa [#allocation4], 1 }

</bundles_post_ra>
